<compile_context>
chip_gen: v5e
topology: v5e:2x2
jax: 0.10.0
libtpu: 0.0.40
codegen_flags: <defaults>
</compile_context>

<pallas_src>
import jax
import jax.numpy as jnp
from jax.experimental import pallas as pl
from jax.experimental.pallas import tpu as pltpu


_LANE_COLS = 1024   # lane-dense last dim (multiple of 128)
_SMALL_COLS = 128   # fallback for tiny inputs
_TILE_ROWS = 512    # 512x1024 f32 block = 2 MiB -> ~8 MiB double-buffered in+out


def _normalize_kernel(scale_ref, bias_ref, x_ref, o_ref):
    # scale/bias are (1,)-shaped f32 SMEM scalars; x_ref/o_ref are VMEM tiles.
    # Compute in f32 on the VPU (mul + add, no per-element divide), cast on store.
    scale = scale_ref[0]
    bias = bias_ref[0]
    xf = x_ref[...].astype(jnp.float32)
    o_ref[...] = (xf * scale + bias).astype(o_ref.dtype)


def normalize_forward(x, mean, std):
    """Pallas implementation of `(x - mean) / std` with scalar mean/std.

    Strength-reduced to x * (1/std) + (-mean/std): one scalar reciprocal in the
    wrapper, pure memory-bound mul+add in the kernel.
    """
    orig_shape = x.shape
    orig_dtype = x.dtype
    total = int(x.size)

    # Scalars stay f32 (32-bit SMEM path) regardless of x dtype.
    mean_f32 = jnp.asarray(mean, jnp.float32)
    std_f32 = jnp.asarray(std, jnp.float32)
    scale = (1.0 / std_f32).reshape((1,))
    bias = (-mean_f32 / std_f32).reshape((1,))

    # Lane-dense 2D slab: last dim a large multiple of 128 independent of W.
    cols = _LANE_COLS if total >= _LANE_COLS else _SMALL_COLS
    rows = -(-total // cols)
    if rows <= _TILE_ROWS:
        tile_r = rows                      # single block == full dim (allowed even if not %8)
        padded_rows = rows
    else:
        tile_r = _TILE_ROWS
        padded_rows = -(-rows // tile_r) * tile_r

    padded_total = padded_rows * cols
    flat = x.reshape(-1)
    if padded_total != total:
        flat = jnp.pad(flat, (0, padded_total - total))
    x2d = flat.reshape(padded_rows, cols)

    grid = (padded_rows // tile_r,)

    out2d = pl.pallas_call(
        _normalize_kernel,
        out_shape=jax.ShapeDtypeStruct((padded_rows, cols), orig_dtype),
        grid=grid,
        in_specs=[
            pl.BlockSpec(memory_space=pltpu.SMEM),            # scale (f32 scalar)
            pl.BlockSpec(memory_space=pltpu.SMEM),            # bias  (f32 scalar)
            pl.BlockSpec((tile_r, cols), lambda i: (i, 0)),   # pipelined input tile
        ],
        out_specs=pl.BlockSpec((tile_r, cols), lambda i: (i, 0)),
        compiler_params=pltpu.CompilerParams(
            dimension_semantics=("parallel",),
        ),
    )(scale, bias, x2d)

    out = out2d.reshape(-1)
    if padded_total != total:
        out = out[:total]
    return out.reshape(orig_shape)


class Normalize:
    """JAX mirror of the PyTorch `normalize` module.

    Parameters are scalars computed from a reference tensor x0:
      mean = x0.mean(), std = x0.std()  (torch default: unbiased, ddof=1).
    """

    def __init__(self, x0):
        x0 = jnp.asarray(x0)
        self.mean = jnp.mean(x0)
        self.std = jnp.std(x0, ddof=1)  # torch.Tensor.std default is unbiased

    def __call__(self, x):
        return normalize_forward(x, self.mean, self.std)

    def inverse(self, x):
        # TODO(synk): trivial elementwise inverse left in plain JAX (fuses upstream).
        return x * self.std + self.mean


if __name__ == "__main__":
    key = jax.random.PRNGKey(0)
    k0, k1, k2 = jax.random.split(key, 3)

    # x0 defines the normalization statistics (module __init__ argument).
    x0 = jax.random.normal(k0, (2, 4, 16, 16), dtype=jnp.float32) * 3.0 + 1.5
    # x is the forward input (NCHW).
    x = jax.random.normal(k1, (2, 4, 16, 16), dtype=jnp.float32) * 3.0 + 1.5

    mod = Normalize(x0)
    out = jax.block_until_ready(mod(x))

    # Reference check (kernel uses x*(1/std) - mean/std: <= a couple ulp vs divide).
    ref = (x - mod.mean) / mod.std
    assert out.shape == x.shape and out.dtype == x.dtype
    assert jnp.allclose(out, ref, rtol=1e-5, atol=1e-6)

    # Exercise the padding path (total not a multiple of 128) at a tiny shape.
    x_odd = jax.random.normal(k2, (2, 3, 7, 5), dtype=jnp.float32) * 2.0 - 0.3
    out_odd = jax.block_until_ready(mod(x_odd))
    ref_odd = (x_odd - mod.mean) / mod.std
    assert out_odd.shape == x_odd.shape
    assert jnp.allclose(out_odd, ref_odd, rtol=1e-5, atol=1e-6)

    print("KERNEL_OK")
</pallas_src>

<mosaic_0001>
module attributes {stable_mosaic.version = 11 : i64} {
  func.func @_normalize_kernel(%arg0: i32, %arg1: memref<1xf32, #tpu.memory_space<smem>>, %arg2: memref<1xf32, #tpu.memory_space<smem>>, %arg3: memref<2x1024xf32, #tpu.memory_space<vmem>>, %arg4: memref<2x1024xf32, #tpu.memory_space<vmem>>) attributes {dimension_semantics = [#tpu.dimension_semantics<parallel>], iteration_bounds = array<i64: 1>, scalar_prefetch = 0 : i64, scratch_operands = 0 : i64, tpu.core_type = #tpu.core_type<tc>, window_params = [{transform_indices = @transform_0, window_bounds = array<i64: 1>}, {transform_indices = @transform_1, window_bounds = array<i64: 1>}, {transform_indices = @transform_2, window_bounds = array<i64: 2, 1024>}, {transform_indices = @transform_3, window_bounds = array<i64: 2, 1024>}]} {
    %c0 = arith.constant 0 : index
    %0 = memref.load %arg1[%c0] : memref<1xf32, #tpu.memory_space<smem>>
    %c0_0 = arith.constant 0 : index
    %1 = memref.load %arg2[%c0_0] : memref<1xf32, #tpu.memory_space<smem>>
    %c0_1 = arith.constant 0 : index
    %c0_2 = arith.constant 0 : index
    %2 = vector.load %arg3[%c0_1, %c0_2] : memref<2x1024xf32, #tpu.memory_space<vmem>>, vector<2x1024xf32>
    %3 = vector.broadcast %0 : f32 to vector<2x1024xf32>
    %4 = arith.mulf %2, %3 : vector<2x1024xf32>
    %5 = vector.broadcast %1 : f32 to vector<2x1024xf32>
    %6 = arith.addf %4, %5 : vector<2x1024xf32>
    %c0_3 = arith.constant 0 : index
    %c0_4 = arith.constant 0 : index
    %7 = vector.load %arg4[%c0_3, %c0_4] : memref<2x1024xf32, #tpu.memory_space<vmem>>, vector<2x1024xf32>
    tpu.vector_store %arg4[%c0_3, %c0_4], %6 {strides = array<i32>} : memref<2x1024xf32, #tpu.memory_space<vmem>>, vector<2x1024xf32>,
    return
  }
  func.func @transform_0(%arg0: i32) -> i32 {
    %c0_i32 = arith.constant 0 : i32
    %c0_i32_0 = arith.constant 0 : i32
    return %c0_i32 : i32
  }
  func.func @transform_1(%arg0: i32) -> i32 {
    %c0_i32 = arith.constant 0 : i32
    %c0_i32_0 = arith.constant 0 : i32
    return %c0_i32 : i32
  }
  func.func @transform_2(%arg0: i32) -> (i32, i32) {
    %c0_i32 = arith.constant 0 : i32
    %c0_i32_0 = arith.constant 0 : i32
    return %arg0, %c0_i32 : i32, i32
  }
  func.func @transform_3(%arg0: i32) -> (i32, i32) {
    %c0_i32 = arith.constant 0 : i32
    %c0_i32_0 = arith.constant 0 : i32
    return %arg0, %c0_i32 : i32, i32
  }
}

</mosaic_0001>

<bundles_post_ra>
// kernel: tpu_custom_call.1
= control target key start
LH: loop header
LB: loop body
LE: loop exit
PB: predicated region body
PF: predicated region fallthrough
CT: control target
= control target key end

     0   :  { %10 = vsyncpa [#allocation5], 0  ;;  %s148_s0 = inlined_call_operand.<no memory space> [shape: f32[1], index: 0, kind: input, shape index: {}]   ;;  %s149_s1 = inlined_call_operand.<no memory space> [shape: f32[1], index: 1, kind: input, shape index: {}]   ;;  %s150_s2 = inlined_call_operand.hbm [shape: f32[2,1024], index: 2, kind: input, shape index: {}]   ;;  %s151_s3 = inlined_call_operand.hbm [shape: f32[2,1024], index: 3, kind: output, shape index: {}]  }
   0x1   :  { %11 = vsyncpa [#allocation6], 0  ;;  %s21_s14 = sshll.u32 %s150_s2, 4  ;;  %s114_s15 = smov [#allocation4]   ;;  %s22_s14 = int_to_ptr.hbm [resolvable:$true] %s21_s14 }
   0x2   :  { %s23_s16 = sshll.u32 %s114_s15, 4  ;;  %s24_s16 = int_to_ptr.vmem [resolvable:$true] %s23_s16 }
   0x3   :  { %26 = dma.hbm_to_vmem [thread:$0]  %s22_s14, 256, %s24_s16, [#allocation5]  }
   0x4   :  { %110 = dma.done.wait [#allocation5], 256  }
   0x5   :  { %111 = vsyncadd [#allocation5], 4294967040  ;;  %v35_v0 = vstv %s148_s0  ;;  %v33_v1 = vld [vmem:[#allocation4] sm:$0xff]  ;;  %v38_v2 = vstv %s149_s1  ;;  %v34_v3 = vld [vmem:[#allocation4 + $0x8] sm:$0xff]  ;;  %s115_s2 = smov [#allocation7]   ;;  %s50_s24 = sshll.u32 %s151_s3, 4  ;;  %s51_s24 = int_to_ptr.hbm [resolvable:$true] %s50_s24 }
   0x6   :  { %v36_v4 = vmul.f32 %v35_v0, %v33_v1  ;;  %v37_v5 = vmul.f32 %v35_v0, %v34_v3  ;;  %s48_s21 = sshll.u32 %s115_s2, 4  ;;  %s49_s21 = int_to_ptr.vmem [resolvable:$true] %s48_s21 }
   0x8   :  { %v39_v6 = vadd.f32 %v38_v2, %v36_v4  ;;  %v40_v7 = vadd.f32 %v38_v2, %v37_v5 }
   0xa   :  { %41 = vst [vmem:[#allocation7] sm:$0xff] %v39_v6 }
   0xb   :  { %42 = vst [vmem:[#allocation7 + $0x8] sm:$0xff] %v40_v7 }
   0xc   :  { %53 = dma.vmem_to_hbm [thread:$0]  %s49_s21, 256, %s51_s24, [#allocation6]  }
   0xd   :  { %112 = dma.done.wait [#allocation6], 256  }
   0xe   :  { %113 = vsyncadd [#allocation6], 4294967040 }
   0xf   :  { %58 = vsyncpa [#allocation5], 1 }
  0x10   :  { %59 = vsyncpa [#allocation6], 1 }

</bundles_post_ra>
